<compile_context>
chip_gen: v6e
topology: v6e:2x2x1
jax: 0.10.0
libtpu: 0.0.40
codegen_flags: <defaults>
</compile_context>

<pallas_src>
import functools

import jax
import jax.numpy as jnp
from jax.experimental import pallas as pl
from jax.experimental.pallas import tpu as pltpu


def _round_up(x, m):
    return (x + m - 1) // m * m


# ----------------------------------------------------------------------------
# Pallas kernel: fused dual 1x1-conv head, W^T @ x layout (channels on
# sublanes, pixels on lanes -> directly NCHW-compatible, lane-dense stores).
# ----------------------------------------------------------------------------
def _head_kernel(ccls, reg_off, creg, x_ref, wT_ref, b_ref, cls_ref, reg_ref):
    # x_ref:   (Cin, TP)     tile of NCHW-flat pixels for one image
    # wT_ref:  (Cpad, Cin)   fused [cls | pad | reg | pad] weight, transposed
    # b_ref:   (Cpad, 1)     fused bias (f32)
    # cls_ref: (Ccls, TP)    classification output tile
    # reg_ref: (Creg, TP)    regression output tile
    y = jnp.dot(wT_ref[...], x_ref[...], preferred_element_type=jnp.float32)
    y = y + b_ref[...]                              # (Cpad, TP), f32
    cls_ref[...] = y[:ccls, :].astype(cls_ref.dtype)
    reg_ref[...] = y[reg_off:reg_off + creg, :].astype(reg_ref.dtype)


@functools.partial(jax.jit, static_argnames=("ccls", "creg", "reg_off", "tile_p"))
def _fused_head_matmul(x3, wT, b, *, ccls, creg, reg_off, tile_p):
    """x3: (N, Cin, P) NCHW-flat activations. Returns (N,Ccls,P), (N,Creg,P)."""
    N, Cin, P = x3.shape
    assert tile_p % 128 == 0
    cpad = wT.shape[0]
    out_dtype = x3.dtype

    # Weights are tiny; cast to the activation dtype (enables the bf16 MXU
    # path). Bias stays f32 so it is added to the f32 accumulator exactly.
    wT = wT.astype(out_dtype)

    # Tile the pixel axis. If the whole level fits in one tile, use its exact
    # extent (full-dim block is always legal); otherwise use tile_p (a
    # multiple of 128) and let Pallas handle the ragged boundary block --
    # no jnp.pad copy of the activations.
    tp = min(tile_p, P)
    grid = (N, pl.cdiv(P, tp))

    kernel = functools.partial(_head_kernel, ccls, reg_off, creg)
    cls3, reg3 = pl.pallas_call(
        kernel,
        out_shape=(
            jax.ShapeDtypeStruct((N, ccls, P), out_dtype),
            jax.ShapeDtypeStruct((N, creg, P), out_dtype),
        ),
        grid_spec=pltpu.PrefetchScalarGridSpec(
            num_scalar_prefetch=0,
            grid=grid,
            in_specs=[
                pl.BlockSpec((None, Cin, tp), lambda n, j: (n, 0, j)),
                # Constant block index -> fetched once, reused every step.
                pl.BlockSpec((cpad, Cin), lambda n, j: (0, 0)),
                pl.BlockSpec((cpad, 1), lambda n, j: (0, 0)),
            ],
            out_specs=[
                pl.BlockSpec((None, ccls, tp), lambda n, j: (n, 0, j)),
                pl.BlockSpec((None, creg, tp), lambda n, j: (n, 0, j)),
            ],
        ),
        compiler_params=pltpu.CompilerParams(
            dimension_semantics=("parallel", "parallel")),
    )(x3, wT, b)
    return cls3, reg3


# ----------------------------------------------------------------------------
# AnchorHead (forward only) in JAX, hot path in Pallas
# ----------------------------------------------------------------------------
class AnchorHeadPallas:
    def __init__(
        self,
        num_classes,
        in_channels,
        feat_channels=256,
        anchor_scales=(8, 16, 32),
        anchor_ratios=(0.5, 1.0, 2.0),
        use_sigmoid_cls=True,
        tile_p=2048,
        key=None,
    ):
        self.num_classes = num_classes
        self.in_channels = in_channels
        self.feat_channels = feat_channels
        self.num_anchors = len(anchor_ratios) * len(anchor_scales)
        self.use_sigmoid_cls = use_sigmoid_cls
        self.cls_out_channels = num_classes - 1 if use_sigmoid_cls else num_classes
        if self.cls_out_channels <= 0:
            raise ValueError("num_classes={} is too small".format(num_classes))
        self.tile_p = tile_p

        self.ccls = self.num_anchors * self.cls_out_channels   # e.g. 27
        self.creg = self.num_anchors * 4                       # e.g. 36

        # Deterministic parameter init (mirrors normal_init(std=0.01, bias=0)).
        if key is None:
            key = jax.random.PRNGKey(0)
        k1, k2 = jax.random.split(key)
        # Stored as (Cin, Cout): the 1x1 conv is einsum("nchw,cd->ndhw").
        self.w_cls = (0.01 * jax.random.normal(k1, (in_channels, self.ccls))).astype(jnp.float32)
        self.b_cls = jnp.zeros((self.ccls,), jnp.float32)
        self.w_reg = (0.01 * jax.random.normal(k2, (in_channels, self.creg))).astype(jnp.float32)
        self.b_reg = jnp.zeros((self.creg,), jnp.float32)

        # Fused + transposed kernel parameters.
        # Rows: [w_cls^T (ccls) | zeros to 8-multiple | w_reg^T (creg) | zeros].
        ccls_pad = _round_up(self.ccls, 8)
        creg_pad = _round_up(self.creg, 8)
        self._reg_off = ccls_pad
        cpad = ccls_pad + creg_pad
        wT = jnp.zeros((cpad, in_channels), jnp.float32)
        wT = wT.at[: self.ccls].set(self.w_cls.T)
        wT = wT.at[ccls_pad: ccls_pad + self.creg].set(self.w_reg.T)
        self.wT_fused = wT
        b = jnp.zeros((cpad, 1), jnp.float32)
        b = b.at[: self.ccls, 0].set(self.b_cls)
        b = b.at[ccls_pad: ccls_pad + self.creg, 0].set(self.b_reg)
        self.b_fused = b

    def forward_single(self, x):
        """x: (N, Cin, H, W) NCHW, same as the PyTorch module."""
        N, C, H, W = x.shape
        assert C == self.in_channels
        # NCHW -> (N, Cin, H*W): a free reshape, no transpose, no HBM copy.
        x3 = x.reshape(N, C, H * W)
        cls3, reg3 = _fused_head_matmul(
            x3, self.wT_fused, self.b_fused,
            ccls=self.ccls, creg=self.creg,
            reg_off=self._reg_off, tile_p=self.tile_p)
        # (N, Cout, H*W) -> NCHW: another free reshape.
        cls_score = cls3.reshape(N, self.ccls, H, W)
        bbox_pred = reg3.reshape(N, self.creg, H, W)
        return cls_score, bbox_pred

    def forward(self, feats):
        """feats: tuple/list of multi-level features, each (N, Cin, H, W).

        Returns (cls_scores, bbox_preds): tuple of lists, like multi_apply.
        """
        results = [self.forward_single(f) for f in feats]
        cls_scores = [r[0] for r in results]
        bbox_preds = [r[1] for r in results]
        return cls_scores, bbox_preds

    # TODO(synk): loss / get_anchors / get_bboxes (anchor generation, target
    # assignment, delta2bbox, multiclass NMS) are data-dependent host-side
    # postprocessing with no clean single-kernel Pallas equivalent; only the
    # forward pass is ported.


def _reference_forward_single(head, x):
    """Pure-JAX reference (NCHW 1x1 conv) to validate the kernel."""
    cls = jnp.einsum("nchw,cd->ndhw", x, head.w_cls) + head.b_cls[None, :, None, None]
    reg = jnp.einsum("nchw,cd->ndhw", x, head.w_reg) + head.b_reg[None, :, None, None]
    return cls, reg


if __name__ == "__main__":
    key = jax.random.PRNGKey(0)
    k_feat1, k_feat2, k_param = jax.random.split(key, 3)

    # Small, module-consistent shapes: batch=2, in_channels=4, two FPN levels.
    num_classes = 4          # use_sigmoid -> cls_out_channels = 3
    in_channels = 4
    head = AnchorHeadPallas(num_classes=num_classes, in_channels=in_channels, key=k_param)

    feats = (
        jax.random.normal(k_feat1, (2, in_channels, 16, 16), jnp.float32),
        jax.random.normal(k_feat2, (2, in_channels, 8, 8), jnp.float32),
    )

    cls_scores, bbox_preds = head.forward(feats)
    jax.block_until_ready(cls_scores)
    jax.block_until_ready(bbox_preds)

    # Shape checks (num_anchors = 9): cls -> 9*3=27 channels, reg -> 36 channels.
    assert cls_scores[0].shape == (2, 27, 16, 16)
    assert bbox_preds[0].shape == (2, 36, 16, 16)
    assert cls_scores[1].shape == (2, 27, 8, 8)
    assert bbox_preds[1].shape == (2, 36, 8, 8)

    # Numerical check against a pure-JAX reference (f32 path).
    for f, cs, bp in zip(feats, cls_scores, bbox_preds):
        ref_cls, ref_reg = _reference_forward_single(head, f)
        assert jnp.allclose(cs, ref_cls, atol=1e-4, rtol=1e-4)
        assert jnp.allclose(bp, ref_reg, atol=1e-4, rtol=1e-4)

    # bf16 activation path (halves the dominant HBM read when the backbone
    # already runs in bf16); f32 accumulation keeps the head accurate.
    feats_bf16 = tuple(f.astype(jnp.bfloat16) for f in feats)
    cls_bf, reg_bf = head.forward(feats_bf16)
    jax.block_until_ready(cls_bf)
    jax.block_until_ready(reg_bf)
    for f, cs, bp in zip(feats, cls_bf, reg_bf):
        ref_cls, ref_reg = _reference_forward_single(head, f)
        assert cs.dtype == jnp.bfloat16 and bp.dtype == jnp.bfloat16
        assert jnp.allclose(cs.astype(jnp.float32), ref_cls, atol=2e-2, rtol=2e-1)
        assert jnp.allclose(bp.astype(jnp.float32), ref_reg, atol=2e-2, rtol=2e-1)

    print("KERNEL_OK")
</pallas_src>

<mosaic_0001>
module attributes {stable_mosaic.version = 11 : i64} {
  func.func @_head_kernel(%arg0: i32, %arg1: i32, %arg2: memref<1x4x256xf32, #tpu.memory_space<vmem>>, %arg3: memref<72x4xf32, #tpu.memory_space<vmem>>, %arg4: memref<72x1xf32, #tpu.memory_space<vmem>>, %arg5: memref<1x27x256xf32, #tpu.memory_space<vmem>>, %arg6: memref<1x36x256xf32, #tpu.memory_space<vmem>>) attributes {dimension_semantics = [#tpu.dimension_semantics<parallel>, #tpu.dimension_semantics<parallel>], iteration_bounds = array<i64: 2, 1>, scalar_prefetch = 0 : i64, scratch_operands = 0 : i64, tpu.core_type = #tpu.core_type<tc>, window_params = [{transform_indices = @transform_0, window_bounds = array<i64: 1, 4, 256>}, {pipeline_mode = #tpu.pipeline_mode<synchronous>, transform_indices = @transform_1, window_bounds = array<i64: 72, 4>}, {pipeline_mode = #tpu.pipeline_mode<synchronous>, transform_indices = @transform_2, window_bounds = array<i64: 72, 1>}, {transform_indices = @transform_3, window_bounds = array<i64: 1, 27, 256>}, {transform_indices = @transform_4, window_bounds = array<i64: 1, 36, 256>}]} {
    %c0 = arith.constant 0 : index
    %c0_0 = arith.constant 0 : index
    %0 = vector.load %arg3[%c0, %c0_0] : memref<72x4xf32, #tpu.memory_space<vmem>>, vector<72x4xf32>
    %c0_1 = arith.constant 0 : index
    %c0_2 = arith.constant 0 : index
    %c0_3 = arith.constant 0 : index
    %1 = vector.load %arg2[%c0_1, %c0_2, %c0_3] : memref<1x4x256xf32, #tpu.memory_space<vmem>>, vector<1x4x256xf32>
    %2 = vector.shape_cast %1 : vector<1x4x256xf32> to vector<4x256xf32>
    %cst = arith.constant dense<0.000000e+00> : vector<72x256xf32>
    %3 = tpu.matmul %0, %2, %cst {dimension_numbers = #tpu.dot_dimension_numbers<[1], [0], [0], [1], [0, 0, 1, 1], [], []>} : vector<72x4xf32>, vector<4x256xf32>, vector<72x256xf32> -> vector<72x256xf32>
    %c0_4 = arith.constant 0 : index
    %c0_5 = arith.constant 0 : index
    %4 = vector.load %arg4[%c0_4, %c0_5] : memref<72x1xf32, #tpu.memory_space<vmem>>, vector<72x1xf32>
    %5 = vector.broadcast %4 : vector<72x1xf32> to vector<72x256xf32>
    %6 = arith.addf %3, %5 : vector<72x256xf32>
    %7 = vector.extract_strided_slice %6 {offsets = [0, 0], sizes = [27, 256], strides = [1, 1]} : vector<72x256xf32> to vector<27x256xf32>
    %c0_6 = arith.constant 0 : index
    %c0_7 = arith.constant 0 : index
    %c0_8 = arith.constant 0 : index
    %8 = vector.load %arg5[%c0_6, %c0_7, %c0_8] : memref<1x27x256xf32, #tpu.memory_space<vmem>>, vector<1x27x256xf32>
    %9 = vector.shape_cast %8 : vector<1x27x256xf32> to vector<27x256xf32>
    %10 = vector.shape_cast %7 : vector<27x256xf32> to vector<1x27x256xf32>
    tpu.vector_store %arg5[%c0_6, %c0_7, %c0_8], %10 {strides = array<i32>} : memref<1x27x256xf32, #tpu.memory_space<vmem>>, vector<1x27x256xf32>,
    %11 = vector.extract_strided_slice %6 {offsets = [32, 0], sizes = [36, 256], strides = [1, 1]} : vector<72x256xf32> to vector<36x256xf32>
    %c0_9 = arith.constant 0 : index
    %c0_10 = arith.constant 0 : index
    %c0_11 = arith.constant 0 : index
    %12 = vector.load %arg6[%c0_9, %c0_10, %c0_11] : memref<1x36x256xf32, #tpu.memory_space<vmem>>, vector<1x36x256xf32>
    %13 = vector.shape_cast %12 : vector<1x36x256xf32> to vector<36x256xf32>
    %14 = vector.shape_cast %11 : vector<36x256xf32> to vector<1x36x256xf32>
    tpu.vector_store %arg6[%c0_9, %c0_10, %c0_11], %14 {strides = array<i32>} : memref<1x36x256xf32, #tpu.memory_space<vmem>>, vector<1x36x256xf32>,
    return
  }
  func.func @transform_0(%arg0: i32, %arg1: i32) -> (i32, i32, i32) {
    %c0_i32 = arith.constant 0 : i32
    %c0_i32_0 = arith.constant 0 : i32
    return %arg0, %c0_i32, %arg1 : i32, i32, i32
  }
  func.func @transform_1(%arg0: i32, %arg1: i32) -> (i32, i32) {
    %c0_i32 = arith.constant 0 : i32
    %c0_i32_0 = arith.constant 0 : i32
    %c0_i32_1 = arith.constant 0 : i32
    return %c0_i32, %c0_i32_0 : i32, i32
  }
  func.func @transform_2(%arg0: i32, %arg1: i32) -> (i32, i32) {
    %c0_i32 = arith.constant 0 : i32
    %c0_i32_0 = arith.constant 0 : i32
    %c0_i32_1 = arith.constant 0 : i32
    return %c0_i32, %c0_i32_0 : i32, i32
  }
  func.func @transform_3(%arg0: i32, %arg1: i32) -> (i32, i32, i32) {
    %c0_i32 = arith.constant 0 : i32
    %c0_i32_0 = arith.constant 0 : i32
    return %arg0, %c0_i32, %arg1 : i32, i32, i32
  }
  func.func @transform_4(%arg0: i32, %arg1: i32) -> (i32, i32, i32) {
    %c0_i32 = arith.constant 0 : i32
    %c0_i32_0 = arith.constant 0 : i32
    return %arg0, %c0_i32, %arg1 : i32, i32, i32
  }
}

</mosaic_0001>

<bundles_post_ra>
// kernel: _fused_head_matmul.1
= control target key start
LH: loop header
LB: loop body
LE: loop exit
PB: predicated region body
PF: predicated region fallthrough
CT: control target
= control target key end

     0   :  { %s742_s15 = smov 0   ;;  %s744_s16 = smov 0   ;;  %s868_s0 = inlined_call_operand.vmem [shape: f32[2,4,256], index: 0, kind: input, shape index: {}]   ;;  %s869_s1 = inlined_call_operand.vmem [shape: f32[72,4], index: 1, kind: input, shape index: {}]   ;;  %s870_s2 = inlined_call_operand.vmem [shape: f32[72,1], index: 2, kind: input, shape index: {}]   ;;  %s871_s3 = inlined_call_operand.vmem [shape: f32[2,27,256], index: 3, kind: output, shape index: {0}]   ;;  %s872_s4 = inlined_call_operand.vmem [shape: f32[2,36,256], index: 4, kind: output, shape index: {1}]  }
   0x1   :  { %s746_s17 = smov 0  }
   0x2 LB: > { %s27_s18 = sadd.s32 1, %s709_s16  ;;  %p638_p0 = scmp.ge.s32.totalorder %s713_s17, 1  ;;  %s713_s17 = sphi %s746_s17, %s15_s17   ;;  %s709_s16 = sphi %s744_s16, %s874_s16   ;;  %s705_s15 = sphi %s742_s15, %s873_s15  }
   0x3   : > { %p29_p1 = scmp.ge.s32.totalorder %s27_s18, 2  ;;  %p188_p2 = scmp.lt.s32.totalorder %s713_s17, 3 }
   0x5   : > { %s876_s18 = smov (%p29_p1, %s27_s18), 0  ;;  %p189_p3 = pnand %p638_p0, %p188_p2 }
   0x6   : > { %p232_p4 = scmp.lt.s32.totalorder (!%p189_p3), %s705_s15, 1 }
   0x7   : > { %192 = sbr.rel (%p189_p3) target bundleno = 234 (0xea), region = 32 }
   0xc   : > { %v715_v0 = vmov 0.0   ;;  %s878_s15 = smov (!%p232_p4, %s705_s15), 1  ;;  %v716_v1 = vmov 0   ;;  %v271_v2 = vld [vmem:[%s870_s2] sm:$0xff]  ;;  %v273_v3 = vld [vmem:[%s870_s2 + $0x10] sm:$0xff]  ;;  %v272_v4 = vld [vmem:[%s870_s2 + $0x8] sm:$0xff] }
   0xd   : > { %424 = vmatprep.mubr.f32.mxu0 %v715_v0  ;;  %454 = vmatprep.mubr.f32.mxu1 %v715_v0  ;;  %s657_s21 = sshll.u32 %s878_s15, 3  ;;  %vm355_vm0 = vcmask 1043456   ;;  %v261_v7 = vld [vmem:[%s869_s1] sm:$0xff]  ;;  %vm327_vm1 = vcmask 31744   ;;  %v266_v8 = vld [vmem:[%s869_s1 + $0x28] sm:$0xff]  ;;  %v274_v10 = vld [vmem:[%s870_s2 + $0x18] sm:$0xff] }
   0xe   : > { %688 = vset.pattern.permute.xlu0 %v716_v1  ;;  %689 = vset.pattern.permute.xlu1 %v716_v1  ;;  %s239_s26 = scalar_lea.vmem %s868_s0, %s657_s21  ;;  %v275_v9 = vld [vmem:[%s870_s2 + $0x20] sm:$0xff]  ;;  %v262_v11 = vld [vmem:[%s869_s1 + $0x8] sm:$0xff]  ;;  %v267_v12 = vld [vmem:[%s869_s1 + $0x30] sm:$0xff]  ;;  %s661_s11 = smul.u32 80, %s878_s15 }
   0xf   : > { %282 = vperm.xlu0 %688, %v271_v2   ;;  %292 = vperm.xlu1 %689, %v273_v3   ;;  %v270_v5 = vld [vmem:[%s239_s26] sm:$0xff]  ;;  %v277_v13 = vld [vmem:[%s870_s2 + $0x30] sm:$0xff]  ;;  %v276_v14 = vld [vmem:[%s870_s2 + $0x28] sm:$0xff]  ;;  %s658_s12 = sshll.u32 %s878_s15, 6 }
  0x10   : > { %v326_v6 = vcombine.high %v270_v5, %v270_v5  ;;  %v263_v15 = vld [vmem:[%s869_s1 + $0x10] sm:$0xff]  ;;  %v268_v16 = vld [vmem:[%s869_s1 + $0x38] sm:$0xff]  ;;  %v279_v17 = vld [vmem:[%s870_s2 + $0x40] sm:$0xff]  ;;  %s834_s19 = scalar_lea.vmem %s871_s3, %s658_s12  ;;  %s839_s22 = scalar_lea.vmem %s872_s4, %s661_s11 }
  0x11   : > { %v278_v18 = vld [vmem:[%s870_s2 + $0x38] sm:$0xff]  ;;  %v269_v20 = vld [vmem:[%s869_s1 + $0x40] sm:$0xff] }
  0x12   : > { %644 = vmatprep.subr.msk.mxu0 %vm355_vm0, %v326_v6  ;;  %659 = vmatprep.subr.msk.mxu1 %vm355_vm0, %v326_v6  ;;  %v264_v19 = vld [vmem:[%s869_s1 + $0x18] sm:$0xff]  ;;  %v265_v21 = vld [vmem:[%s869_s1 + $0x20] sm:$0xff] }
  0x13   : > { %287 = vperm.xlu0 %688, %v272_v4   ;;  %645 = vmatpush1.msk.msra.mxu0 %vm355_vm0, %v270_v5 }
  0x14   : > { %660 = vmatpush1.msk.msra.mxu1 %vm355_vm0, %v270_v5  ;;  %646 = vmatmul.mubr.msk.f32.vlgmr.msra.gmra.mxu0 %vm327_vm1, %v261_v7 }
  0x15   : > { %651 = vmatmul.mubr.msk.f32.vlgmr.msra.gmra.mxu1 %vm327_vm1, %v266_v8  ;;  %430 = vmatprep.mubr.f32.mxu0 %v715_v0 }
  0x16   : > { %460 = vmatprep.mubr.f32.mxu1 %v715_v0  ;;  %297 = vperm.xlu1 %689, %v274_v10  }
  0x17   : > { %302 = vperm.xlu0 %688, %v275_v9  }
  0x18   : > { %647 = vmatmul.mubr.msk.f32.gmra.mxu0 %vm327_vm1, %v262_v11 }
  0x19   : > { %652 = vmatmul.mubr.msk.f32.gmra.mxu1 %vm327_vm1, %v267_v12  ;;  %436 = vmatprep.mubr.f32.mxu0 %v715_v0 }
  0x1a   : > { %466 = vmatprep.mubr.f32.mxu1 %v715_v0  ;;  %307 = vperm.xlu1 %689, %v276_v14  }
  0x1b   : > { %312 = vperm.xlu0 %688, %v277_v13  }
  0x1c   : > { %648 = vmatmul.mubr.msk.f32.gmra.mxu0 %vm327_vm1, %v263_v15 }
  0x1d   : > { %653 = vmatmul.mubr.msk.f32.gmra.mxu1 %vm327_vm1, %v268_v16  ;;  %442 = vmatprep.mubr.f32.mxu0 %v715_v0 }
  0x1e   : > { %472 = vmatprep.mubr.f32.mxu1 %v715_v0  ;;  %317 = vperm.xlu1 %689, %v278_v18  }
  0x1f   : > { %322 = vperm.xlu0 %688, %v279_v17  }
  0x20   : > { %649 = vmatmul.mubr.msk.f32.gmra.mxu0 %vm327_vm1, %v264_v19 }
  0x21   : > { %654 = vmatmul.mubr.msk.f32.gmra.mxu1 %vm327_vm1, %v269_v20  ;;  %448 = vmatprep.mubr.f32.mxu0 %v715_v0 }
  0x24   : > { %650 = vmatmul.mubr.msk.f32.gmra.mxu0 %vm327_vm1, %v265_v21 }
  0x8a   : > { %v283_v22 = vpop.permute.xlu0 %282  ;;  %v293_v23 = vpop.permute.xlu1 %292 }
  0x8e   : > { %v288_v24 = vpop.permute.xlu0 %287 }
  0x91   : > { %v298_v25 = vpop.permute.xlu1 %297 }
  0x92   : > { %v303_v26 = vpop.permute.xlu0 %302 }
  0x95   : > { %v308_v27 = vpop.permute.xlu1 %307 }
  0x96   : > { %v313_v34 = vpop.permute.xlu0 %312 }
  0x99   : > { %v318_v43 = vpop.permute.xlu1 %317 }
  0x9a   : > { %v323_v52 = vpop.permute.xlu0 %322 }
  0xd4   : > { %v426_v28 = vpop.f32.mrf.mxu0 }
  0xd5   : > { %v456_v29 = vpop.f32.mrf.mxu1  ;;  %v427_v30 = vadd.f32 %v426_v28, %v283_v22 }
  0xd6   : > { %v457_v31 = vadd.f32 %v456_v29, %v308_v27  ;;  %v428_v32 = vpop.f32.mrf.mxu0 }
  0xd7   : > { %v458_v33 = vpop.f32.mrf.mxu1  ;;  %479 = vst [vmem:[%s834_s19] sm:$0xff] %v427_v30  ;;  %v429_v35 = vadd.f32 %v428_v32, %v283_v22 }
  0xd8   : > { %489 = vst [vmem:[%s839_s22 + $0x10] sm:$0xff] %v457_v31  ;;  %v459_v36 = vadd.f32 %v458_v33, %v308_v27  ;;  %v432_v37 = vpop.f32.mrf.mxu0 }
  0xd9   : > { %v462_v38 = vpop.f32.mrf.mxu1  ;;  %480 = vst [vmem:[%s834_s19 + $0x8] sm:$0xff] %v429_v35  ;;  %v433_v39 = vadd.f32 %v432_v37, %v288_v24 }
  0xda   : > { %490 = vst [vmem:[%s839_s22 + $0x18] sm:$0xff] %v459_v36  ;;  %v463_v40 = vadd.f32 %v462_v38, %v313_v34  ;;  %v434_v41 = vpop.f32.mrf.mxu0 }
  0xdb   : > { %v464_v42 = vpop.f32.mrf.mxu1  ;;  %481 = vst [vmem:[%s834_s19 + $0x10] sm:$0xff] %v433_v39  ;;  %v435_v44 = vadd.f32 %v434_v41, %v288_v24 }
  0xdc   : > { %491 = vst [vmem:[%s839_s22 + $0x20] sm:$0xff] %v463_v40  ;;  %v465_v45 = vadd.f32 %v464_v42, %v313_v34  ;;  %v438_v46 = vpop.f32.mrf.mxu0 }
  0xdd   : > { %v468_v47 = vpop.f32.mrf.mxu1  ;;  %482 = vst [vmem:[%s834_s19 + $0x18] sm:$0xff] %v435_v44  ;;  %v439_v48 = vadd.f32 %v438_v46, %v293_v23 }
  0xde   : > { %492 = vst [vmem:[%s839_s22 + $0x28] sm:$0xff] %v465_v45  ;;  %v469_v49 = vadd.f32 %v468_v47, %v318_v43  ;;  %v440_v50 = vpop.f32.mrf.mxu0 }
  0xdf   : > { %v470_v51 = vpop.f32.mrf.mxu1  ;;  %483 = vst [vmem:[%s834_s19 + $0x20] sm:$0xff] %v439_v48  ;;  %v441_v53 = vadd.f32 %v440_v50, %v293_v23 }
  0xe0   : > { %493 = vst [vmem:[%s839_s22 + $0x30] sm:$0xff] %v469_v49  ;;  %v471_v54 = vadd.f32 %v470_v51, %v318_v43  ;;  %v444_v55 = vpop.f32.mrf.mxu0 }
  0xe1   : > { %v474_v56 = vpop.f32.mrf.mxu1  ;;  %484 = vst [vmem:[%s834_s19 + $0x28] sm:$0xff] %v441_v53  ;;  %v445_v57 = vadd.f32 %v444_v55, %v298_v25 }
  0xe2   : > { %494 = vst [vmem:[%s839_s22 + $0x38] sm:$0xff] %v471_v54  ;;  %v475_v58 = vadd.f32 %v474_v56, %v323_v52  ;;  %v446_v59 = vpop.f32.mrf.mxu0 }
  0xe3   : > { %v476_v60 = vpop.f32.mrf.mxu1  ;;  %485 = vst [vmem:[%s834_s19 + $0x30] sm:$0x7] %v445_v57  ;;  %v447_v61 = vadd.f32 %v446_v59, %v298_v25 }
  0xe4   : > { %495 = vst [vmem:[%s839_s22 + $0x40] sm:$0xf] %v475_v58  ;;  %v477_v62 = vadd.f32 %v476_v60, %v323_v52  ;;  %v450_v63 = vpop.f32.mrf.mxu0 }
  0xe5   : > { %486 = vst [vmem:[%s834_s19 + $0x38] sm:$0x7] %v447_v61  ;;  %v451_v0 = vadd.f32 %v450_v63, %v303_v26 }
  0xe6   : > { %496 = vst [vmem:[%s839_s22 + $0x48] sm:$0xf] %v477_v62  ;;  %v452_v1 = vpop.f32.mrf.mxu0 }
  0xe7   : > { %487 = vst [vmem:[%s839_s22] sm:$0xff] %v451_v0  ;;  %v453_v2 = vadd.f32 %v452_v1, %v303_v26 }
  0xe9   : > { %488 = vst [vmem:[%s839_s22 + $0x8] sm:$0xff] %v453_v2 }
  0xea PF: > { %s15_s17 = sadd.s32 1, %s713_s17   ;;  %s873_s15 = smov %s709_s16 }
  0xeb   : > { %p12_p5 = scmp.ge.s32.totalorder %s15_s17, 4   ;;  %s874_s16 = smov %s876_s18 }
  0xed   :  { %14 = sbr.rel (!%p12_p5) target bundleno = 2 (0x2), region = 74 }

</bundles_post_ra>
